<compile_context>
chip_gen: v7x
topology: tpu7x:2x2x1
jax: 0.10.0
libtpu: 0.0.40
codegen_flags: <defaults>
</compile_context>

<pallas_src>
import numpy as np
import jax
import jax.numpy as jnp
from jax.experimental import pallas as pl
from jax.experimental.pallas import tpu as pltpu


def fnn_kernel(x_ref, w1_ref, b1_ref, w2_ref, b2_ref, w3_ref, b3_ref,
               w4_ref, b4_ref, scale_ref, o_ref):
    # scale = n * a1, SMEM scalar (broadcast over everything on the scalar path)
    s = scale_ref[0]

    x = x_ref[...]

    # layer 1: tanh(s * (x @ W1 + b1))   (f32 accumulation on the MXU)
    h = jnp.dot(x, w1_ref[...], preferred_element_type=jnp.float32) + b1_ref[...]
    y = jnp.tanh(s * h)

    # layer 2
    h = jnp.dot(y.astype(w2_ref.dtype), w2_ref[...],
                preferred_element_type=jnp.float32) + b2_ref[...]
    y = jnp.tanh(s * h)

    # layer 3
    h = jnp.dot(y.astype(w3_ref.dtype), w3_ref[...],
                preferred_element_type=jnp.float32) + b3_ref[...]
    y = jnp.tanh(s * h)

    # layer 4 (no tanh, just the scale); output block is lane-dense (padded cols)
    h = jnp.dot(y.astype(w4_ref.dtype), w4_ref[...],
                preferred_element_type=jnp.float32) + b4_ref[...]
    o_ref[...] = (s * h).astype(o_ref.dtype)


def fnn_forward(x, params, *, tm=512, use_bf16=False):
    """x: [N, D_in]. params: weights [in,out], biases [1,out], scale [1] (= n*a1)."""
    N, D_in = x.shape
    H = params["w1"].shape[1]
    D_out = params["w4"].shape[1]

    # ---- lane-dense output: pad last layer to a multiple of 128 output columns
    D_pad = max(128, pl.cdiv(D_out, 128) * 128)
    w4 = jnp.pad(params["w4"], ((0, 0), (0, D_pad - D_out)))
    b4 = jnp.pad(params["b4"], ((0, 0), (0, D_pad - D_out)))
    w1, w2, w3 = params["w1"], params["w2"], params["w3"]
    b1, b2, b3 = params["b1"], params["b2"], params["b3"]
    scale = params["scale"].reshape(-1)[:1].astype(jnp.float32)   # shape (1,), SMEM

    xin = x
    if use_bf16:
        xin = x.astype(jnp.bfloat16)
        w1, w2, w3, w4 = (w.astype(jnp.bfloat16) for w in (w1, w2, w3, w4))

    # ---- batch tile: large enough to amortize per-step overhead (~0.35 us),
    # but capped so the grid keeps >= 2 steps (v7x megacore sharding).
    tm = int(tm)
    half = ((max(N // 2, 8) + 7) // 8) * 8
    tm = max(8, min(tm, half))

    Np = pl.cdiv(N, tm) * tm
    if Np != N:
        xin = jnp.pad(xin, ((0, Np - N), (0, 0)))
    grid = (Np // tm,)

    # ---- VMEM budget (double-buffered inputs/outputs + intermediates), clamped
    # so it is safe against v7x's 64 MiB physical VMEM.
    _lane = lambda n: ((n + 127) // 128) * 128
    _sub = lambda n: ((n + 7) // 8) * 8
    bpe_w = 2 if use_bf16 else 4
    vmem_need = (
        2 * tm * _lane(D_in) * bpe_w                                   # x tiles
        + 2 * tm * D_pad * 4                                           # out tiles
        + 2 * bpe_w * (_sub(D_in) * _lane(H) + 2 * _sub(H) * _lane(H)
                       + _sub(H) * D_pad)                              # weights
        + 2 * 4 * (3 * 8 * _lane(H) + 8 * D_pad)                       # biases
        + 6 * tm * _lane(H) * 4                                        # h / y live
    )
    vmem_limit = int(min(max(2 * vmem_need, 16 * 1024 * 1024), 40 * 1024 * 1024))

    fixed = lambda shape: pl.BlockSpec(shape, lambda i: (0, 0))        # resident weights

    out = pl.pallas_call(
        fnn_kernel,
        out_shape=jax.ShapeDtypeStruct((Np, D_pad), x.dtype),
        grid_spec=pltpu.PrefetchScalarGridSpec(
            num_scalar_prefetch=0,
            grid=grid,
            in_specs=[
                pl.BlockSpec((tm, D_in), lambda i: (i, 0)),            # x tile
                fixed((D_in, H)), fixed((1, H)),                       # W1, b1
                fixed((H, H)),    fixed((1, H)),                       # W2, b2
                fixed((H, H)),    fixed((1, H)),                       # W3, b3
                fixed((H, D_pad)), fixed((1, D_pad)),                  # W4, b4 (padded)
                pl.BlockSpec(memory_space=pltpu.MemorySpace.SMEM),     # scale = n*a1
            ],
            out_specs=pl.BlockSpec((tm, D_pad), lambda i: (i, 0)),
        ),
        compiler_params=pltpu.CompilerParams(
            dimension_semantics=("parallel",),
            vmem_limit_bytes=vmem_limit),
    )(xin, w1, b1, w2, b2, w3, b3, w4, b4, scale)

    return out[:N, :D_out]


def init_params(key, D_in, H, D_out):
    ks = jax.random.split(key, 8)
    # PyTorch: normal_(weight, std=sqrt(2/(fan_in+fan_out))); weights stored [in, out] here
    w1 = jax.random.normal(ks[0], (D_in, H), jnp.float32) * np.sqrt(2.0 / (D_in + H))
    w2 = jax.random.normal(ks[1], (H, H), jnp.float32) * np.sqrt(2.0 / (H + H))
    w3 = jax.random.normal(ks[2], (H, H), jnp.float32) * np.sqrt(2.0 / (H + H))
    w4 = jax.random.normal(ks[3], (H, D_out), jnp.float32) * np.sqrt(2.0 / (H + D_out))
    b1 = jax.random.normal(ks[4], (1, H), jnp.float32)
    b2 = jax.random.normal(ks[5], (1, H), jnp.float32)
    b3 = jax.random.normal(ks[6], (1, H), jnp.float32)
    b4 = jax.random.normal(ks[7], (1, D_out), jnp.float32)
    a1 = jnp.float32(0.2)
    n = 1.0 / a1                       # n = 1 / a1.data  =>  n * a1 == 1.0 at init
    scale = jnp.full((1,), n * a1, jnp.float32)
    return dict(w1=w1, b1=b1, w2=w2, b2=b2, w3=w3, b3=b3, w4=w4, b4=b4,
                scale=scale)


def fnn_reference(x, p):
    s = p["scale"][0]
    y1 = jnp.tanh(s * (x @ p["w1"] + p["b1"]))
    y2 = jnp.tanh(s * (y1 @ p["w2"] + p["b2"]))
    y3 = jnp.tanh(s * (y2 @ p["w3"] + p["b3"]))
    return s * (y3 @ p["w4"] + p["b4"])


if __name__ == "__main__":
    D_in, H, D_out = 8, 32, 4
    N = 256                      # batch of collocation points

    key = jax.random.PRNGKey(0)
    kx, kp = jax.random.split(key)
    x = jax.random.normal(kx, (N, D_in), jnp.float32)
    params = init_params(kp, D_in, H, D_out)

    y = fnn_forward(x, params)   # default tm=512 auto-caps to 128 -> grid of 2
    y = jax.block_until_ready(y)

    y_ref = fnn_reference(x, params)
    np.testing.assert_allclose(np.asarray(y), np.asarray(y_ref), rtol=1e-5, atol=1e-5)

    print("KERNEL_OK")
</pallas_src>

<mosaic_0001>
module attributes {stable_mosaic.version = 11 : i64} {
  func.func @fnn_kernel(%arg0: i32, %arg1: memref<128x8xf32, #tpu.memory_space<vmem>>, %arg2: memref<8x32xf32, #tpu.memory_space<vmem>>, %arg3: memref<1x32xf32, #tpu.memory_space<vmem>>, %arg4: memref<32x32xf32, #tpu.memory_space<vmem>>, %arg5: memref<1x32xf32, #tpu.memory_space<vmem>>, %arg6: memref<32x32xf32, #tpu.memory_space<vmem>>, %arg7: memref<1x32xf32, #tpu.memory_space<vmem>>, %arg8: memref<32x128xf32, #tpu.memory_space<vmem>>, %arg9: memref<1x128xf32, #tpu.memory_space<vmem>>, %arg10: memref<1xf32, #tpu.memory_space<smem>>, %arg11: memref<128x128xf32, #tpu.memory_space<vmem>>) attributes {dimension_semantics = [#tpu.dimension_semantics<parallel>], iteration_bounds = array<i64: 2>, scalar_prefetch = 0 : i64, scratch_operands = 0 : i64, tpu.core_type = #tpu.core_type<tc>, window_params = [{transform_indices = @transform_0, window_bounds = array<i64: 128, 8>}, {pipeline_mode = #tpu.pipeline_mode<synchronous>, transform_indices = @transform_1, window_bounds = array<i64: 8, 32>}, {pipeline_mode = #tpu.pipeline_mode<synchronous>, transform_indices = @transform_2, window_bounds = array<i64: 1, 32>}, {pipeline_mode = #tpu.pipeline_mode<synchronous>, transform_indices = @transform_3, window_bounds = array<i64: 32, 32>}, {pipeline_mode = #tpu.pipeline_mode<synchronous>, transform_indices = @transform_4, window_bounds = array<i64: 1, 32>}, {pipeline_mode = #tpu.pipeline_mode<synchronous>, transform_indices = @transform_5, window_bounds = array<i64: 32, 32>}, {pipeline_mode = #tpu.pipeline_mode<synchronous>, transform_indices = @transform_6, window_bounds = array<i64: 1, 32>}, {pipeline_mode = #tpu.pipeline_mode<synchronous>, transform_indices = @transform_7, window_bounds = array<i64: 32, 128>}, {pipeline_mode = #tpu.pipeline_mode<synchronous>, transform_indices = @transform_8, window_bounds = array<i64: 1, 128>}, {transform_indices = @transform_9, window_bounds = array<i64: 1>}, {transform_indices = @transform_10, window_bounds = array<i64: 128, 128>}]} {
    %c0 = arith.constant 0 : index
    %0 = memref.load %arg10[%c0] : memref<1xf32, #tpu.memory_space<smem>>
    %c0_0 = arith.constant 0 : index
    %c0_1 = arith.constant 0 : index
    %1 = vector.load %arg1[%c0_0, %c0_1] : memref<128x8xf32, #tpu.memory_space<vmem>>, vector<128x8xf32>
    %c0_2 = arith.constant 0 : index
    %c0_3 = arith.constant 0 : index
    %2 = vector.load %arg2[%c0_2, %c0_3] : memref<8x32xf32, #tpu.memory_space<vmem>>, vector<8x32xf32>
    %cst = arith.constant dense<0.000000e+00> : vector<128x32xf32>
    %3 = tpu.matmul %1, %2, %cst {dimension_numbers = #tpu.dot_dimension_numbers<[1], [0], [0], [1], [0, 0, 1, 1], [], []>} : vector<128x8xf32>, vector<8x32xf32>, vector<128x32xf32> -> vector<128x32xf32>
    %c0_4 = arith.constant 0 : index
    %c0_5 = arith.constant 0 : index
    %4 = vector.load %arg3[%c0_4, %c0_5] : memref<1x32xf32, #tpu.memory_space<vmem>>, vector<1x32xf32>
    %5 = vector.broadcast %4 : vector<1x32xf32> to vector<128x32xf32>
    %6 = arith.addf %3, %5 : vector<128x32xf32>
    %7 = vector.broadcast %0 : f32 to vector<128x32xf32>
    %8 = arith.mulf %7, %6 : vector<128x32xf32>
    %9 = math.tanh %8 : vector<128x32xf32>
    %c0_6 = arith.constant 0 : index
    %c0_7 = arith.constant 0 : index
    %10 = vector.load %arg4[%c0_6, %c0_7] : memref<32x32xf32, #tpu.memory_space<vmem>>, vector<32x32xf32>
    %cst_8 = arith.constant dense<0.000000e+00> : vector<128x32xf32>
    %11 = tpu.matmul %9, %10, %cst_8 {dimension_numbers = #tpu.dot_dimension_numbers<[1], [0], [0], [1], [0, 0, 1, 1], [], []>} : vector<128x32xf32>, vector<32x32xf32>, vector<128x32xf32> -> vector<128x32xf32>
    %c0_9 = arith.constant 0 : index
    %c0_10 = arith.constant 0 : index
    %12 = vector.load %arg5[%c0_9, %c0_10] : memref<1x32xf32, #tpu.memory_space<vmem>>, vector<1x32xf32>
    %13 = vector.broadcast %12 : vector<1x32xf32> to vector<128x32xf32>
    %14 = arith.addf %11, %13 : vector<128x32xf32>
    %15 = vector.broadcast %0 : f32 to vector<128x32xf32>
    %16 = arith.mulf %15, %14 : vector<128x32xf32>
    %17 = math.tanh %16 : vector<128x32xf32>
    %c0_11 = arith.constant 0 : index
    %c0_12 = arith.constant 0 : index
    %18 = vector.load %arg6[%c0_11, %c0_12] : memref<32x32xf32, #tpu.memory_space<vmem>>, vector<32x32xf32>
    %cst_13 = arith.constant dense<0.000000e+00> : vector<128x32xf32>
    %19 = tpu.matmul %17, %18, %cst_13 {dimension_numbers = #tpu.dot_dimension_numbers<[1], [0], [0], [1], [0, 0, 1, 1], [], []>} : vector<128x32xf32>, vector<32x32xf32>, vector<128x32xf32> -> vector<128x32xf32>
    %c0_14 = arith.constant 0 : index
    %c0_15 = arith.constant 0 : index
    %20 = vector.load %arg7[%c0_14, %c0_15] : memref<1x32xf32, #tpu.memory_space<vmem>>, vector<1x32xf32>
    %21 = vector.broadcast %20 : vector<1x32xf32> to vector<128x32xf32>
    %22 = arith.addf %19, %21 : vector<128x32xf32>
    %23 = vector.broadcast %0 : f32 to vector<128x32xf32>
    %24 = arith.mulf %23, %22 : vector<128x32xf32>
    %25 = math.tanh %24 : vector<128x32xf32>
    %c0_16 = arith.constant 0 : index
    %c0_17 = arith.constant 0 : index
    %26 = vector.load %arg8[%c0_16, %c0_17] : memref<32x128xf32, #tpu.memory_space<vmem>>, vector<32x128xf32>
    %cst_18 = arith.constant dense<0.000000e+00> : vector<128x128xf32>
    %27 = tpu.matmul %25, %26, %cst_18 {dimension_numbers = #tpu.dot_dimension_numbers<[1], [0], [0], [1], [0, 0, 1, 1], [], []>} : vector<128x32xf32>, vector<32x128xf32>, vector<128x128xf32> -> vector<128x128xf32>
    %c0_19 = arith.constant 0 : index
    %c0_20 = arith.constant 0 : index
    %28 = vector.load %arg9[%c0_19, %c0_20] : memref<1x128xf32, #tpu.memory_space<vmem>>, vector<1x128xf32>
    %29 = vector.broadcast %28 : vector<1x128xf32> to vector<128x128xf32>
    %30 = arith.addf %27, %29 : vector<128x128xf32>
    %31 = vector.broadcast %0 : f32 to vector<128x128xf32>
    %32 = arith.mulf %31, %30 : vector<128x128xf32>
    %c0_21 = arith.constant 0 : index
    %c0_22 = arith.constant 0 : index
    %33 = vector.load %arg11[%c0_21, %c0_22] : memref<128x128xf32, #tpu.memory_space<vmem>>, vector<128x128xf32>
    tpu.vector_store %arg11[%c0_21, %c0_22], %32 {strides = array<i32>} : memref<128x128xf32, #tpu.memory_space<vmem>>, vector<128x128xf32>,
    return
  }
  func.func @transform_0(%arg0: i32) -> (i32, i32) {
    %c0_i32 = arith.constant 0 : i32
    %c0_i32_0 = arith.constant 0 : i32
    return %arg0, %c0_i32 : i32, i32
  }
  func.func @transform_1(%arg0: i32) -> (i32, i32) {
    %c0_i32 = arith.constant 0 : i32
    %c0_i32_0 = arith.constant 0 : i32
    %c0_i32_1 = arith.constant 0 : i32
    return %c0_i32, %c0_i32_0 : i32, i32
  }
  func.func @transform_2(%arg0: i32) -> (i32, i32) {
    %c0_i32 = arith.constant 0 : i32
    %c0_i32_0 = arith.constant 0 : i32
    %c0_i32_1 = arith.constant 0 : i32
    return %c0_i32, %c0_i32_0 : i32, i32
  }
  func.func @transform_3(%arg0: i32) -> (i32, i32) {
    %c0_i32 = arith.constant 0 : i32
    %c0_i32_0 = arith.constant 0 : i32
    %c0_i32_1 = arith.constant 0 : i32
    return %c0_i32, %c0_i32_0 : i32, i32
  }
  func.func @transform_4(%arg0: i32) -> (i32, i32) {
    %c0_i32 = arith.constant 0 : i32
    %c0_i32_0 = arith.constant 0 : i32
    %c0_i32_1 = arith.constant 0 : i32
    return %c0_i32, %c0_i32_0 : i32, i32
  }
  func.func @transform_5(%arg0: i32) -> (i32, i32) {
    %c0_i32 = arith.constant 0 : i32
    %c0_i32_0 = arith.constant 0 : i32
    %c0_i32_1 = arith.constant 0 : i32
    return %c0_i32, %c0_i32_0 : i32, i32
  }
  func.func @transform_6(%arg0: i32) -> (i32, i32) {
    %c0_i32 = arith.constant 0 : i32
    %c0_i32_0 = arith.constant 0 : i32
    %c0_i32_1 = arith.constant 0 : i32
    return %c0_i32, %c0_i32_0 : i32, i32
  }
  func.func @transform_7(%arg0: i32) -> (i32, i32) {
    %c0_i32 = arith.constant 0 : i32
    %c0_i32_0 = arith.constant 0 : i32
    %c0_i32_1 = arith.constant 0 : i32
    return %c0_i32, %c0_i32_0 : i32, i32
  }
  func.func @transform_8(%arg0: i32) -> (i32, i32) {
    %c0_i32 = arith.constant 0 : i32
    %c0_i32_0 = arith.constant 0 : i32
    %c0_i32_1 = arith.constant 0 : i32
    return %c0_i32, %c0_i32_0 : i32, i32
  }
  func.func @transform_9(%arg0: i32) -> i32 {
    %c0_i32 = arith.constant 0 : i32
    %c0_i32_0 = arith.constant 0 : i32
    return %c0_i32 : i32
  }
  func.func @transform_10(%arg0: i32) -> (i32, i32) {
    %c0_i32 = arith.constant 0 : i32
    %c0_i32_0 = arith.constant 0 : i32
    return %arg0, %c0_i32 : i32, i32
  }
}

</mosaic_0001>

<bundles_post_ra>
// kernel: tpu_custom_call.1
= control target key start
LH: loop header
LB: loop body
LE: loop exit
PB: predicated region body
PF: predicated region fallthrough
CT: control target
= control target key end

     0   :  { %s2361_s0 = inlined_call_operand.vmem [shape: f32[256,8], index: 0, kind: input, shape index: {}]   ;;  %s2362_s1 = inlined_call_operand.vmem [shape: f32[8,32], index: 1, kind: input, shape index: {}]   ;;  %s2363_s2 = inlined_call_operand.vmem [shape: f32[1,32], index: 2, kind: input, shape index: {}]   ;;  %s2364_s3 = inlined_call_operand.vmem [shape: f32[32,32], index: 3, kind: input, shape index: {}]   ;;  %s2365_s4 = inlined_call_operand.vmem [shape: f32[1,32], index: 4, kind: input, shape index: {}]   ;;  %s2366_s5 = inlined_call_operand.vmem [shape: f32[32,32], index: 5, kind: input, shape index: {}]   ;;  %s2367_s6 = inlined_call_operand.vmem [shape: f32[1,32], index: 6, kind: input, shape index: {}]   ;;  %s2368_s7 = inlined_call_operand.vmem [shape: f32[32,128], index: 7, kind: input, shape index: {}]   ;;  %s2369_s8 = inlined_call_operand.vmem [shape: f32[1,128], index: 8, kind: input, shape index: {}]   ;;  %s2370_s9 = inlined_call_operand.<no memory space> [shape: f32[1], index: 9, kind: input, shape index: {}]   ;;  %s2371_s10 = inlined_call_operand.hbm [shape: f32[256,128], index: 10, kind: output, shape index: {}]  }
   0x1   :  { %15 = sst [smem:[#allocation2]] %s2370_s9 }
   0x2   :  { %16 = vsyncpa [#allocation4], 0 }
   0x3   :  { %18 = vsyncpa [#allocation4 + $0x1], 0  ;;  %s1965_s15 = smov 0   ;;  %s1967_s16 = smov 0  }
   0x4   :  { %s1969_s17 = smov 0   ;;  %s1971_s18 = smov 0  }
   0x5 LB: > { %s1986_s9 = sadd.s32 4294967295, %s1902_s18   ;;  %s1399_s19 = sadd.s32 4294967294, %s1902_s18   ;;  %s1902_s18 = sphi %s1971_s18, %s2377_s18   ;;  %s1898_s17 = sphi %s1969_s17, %s2376_s17   ;;  %s1894_s16 = sphi %s1967_s16, %s2375_s16   ;;  %s1890_s15 = sphi %s1965_s15, %s2374_s15  }
   0x6   : > { %s1990_s20 = sadd.s32 1, %s1902_s18   ;;  %s246_s21 = sadd.s32 1, %s1898_s17 }
   0x7   : > { %s243_s22 = ssub.s32 %s1902_s18, %s1990_s20  ;;  %p256_p0 = scmp.ne.s32.totalorder %s1898_s17, %s1894_s16 }
   0x8   : > { %p244_p1 = scmp.eq.s32.totalorder %s243_s22, 0  ;;  %p257_p2 = scmp.eq.s32.totalorder %s1986_s9, 1 }
   0x9   : > { %p262_p3 = scmp.ne.s32.totalorder %s1894_s16, %s1890_s15  ;;  %p263_p4 = scmp.eq.s32.totalorder %s1399_s19, 1 }
   0xa   : > { %s2001_s23 = scalar_select %p244_p1, %s1898_s17, %s246_s21  }
   0xb   : > { %p2003_p5 = por %p257_p2, %p256_p0  ;;  %p2007_p6 = por %p263_p4, %p262_p3 }
   0xc   : > { %p1402_p7 = scmp.ge.s32.totalorder %s1902_s18, 1  ;;  %p317_p8 = scmp.lt.s32.totalorder %s1902_s18, 3 }
   0xe   : > { %p318_p9 = pnand %p1402_p7, %p317_p8 }
   0xf   : > { %v379_v0 = vld [vmem:[%s2362_s1] sm:$0xff] (!%p318_p9)  ;;  %s1404_s28 = sshll.u32 (!%p318_p9), %s1986_s9, 4  ;;  %vm387_vm0 = vcmask (!%p318_p9), 64512   ;;  %v615_v18 = vld [vmem:[%s2364_s3 + $0x8] sm:$0xff] (!%p318_p9)  ;;  %v616_v20 = vld [vmem:[%s2364_s3 + $0x10] sm:$0xff] (!%p318_p9)  ;;  %s362_s13 = sld [smem:[#allocation2]] (!%p318_p9) }
  0x10   : > { %321 = sbr.rel (%p318_p9) target bundleno = 975 (0x3cf), region = 60  ;;  %1557 = vmatprep.subr.mxu0 (!%p318_p9), %v379_v0  ;;  %p356_p10 = scmp.lt.s32.totalorder (!%p318_p9), %s1404_s28, 31  ;;  %v614_v17 = vld [vmem:[%s2364_s3] sm:$0xff] (!%p318_p9)  ;;  %v617_v21 = vld [vmem:[%s2364_s3 + $0x18] sm:$0xff] (!%p318_p9)  ;;  %v852_v24 = vld [vmem:[%s2366_s5 + $0x8] sm:$0xff] (!%p318_p9)  ;;  %vm625_vm1 = vcmask (!%p318_p9), 261120  }
  0x11   : > { %1558 = vmatpush3.msra.mxu0 (!%p318_p9), %v379_v0  ;;  %v1679_v19 = vpack.c.bf16 (!%p318_p9), %v615_v18, %v614_v17  ;;  %v1683_v22 = vpack.c.bf16 (!%p318_p9), %v617_v21, %v616_v20  ;;  %v851_v23 = vld [vmem:[%s2366_s5] sm:$0xff] (!%p318_p9)  ;;  %s1904_s27 = smov (!%p318_p9), [#allocation3]  }
  0x12   : > { %v1687_v25 = vpack.c.bf16 (!%p318_p9), %v852_v24, %v851_v23  ;;  %v2075_v26 = vld [vmem:[%s2363_s2] ss:$0 sm:$0xff] (!%p318_p9) }
  0x13   : > { %1680 = vmatprep.subr.bf16.mxu1 (!%p318_p9), %v1679_v19 }
  0x14   : > { %1682 = vmatpush3.bf16.msra.mxu1 (!%p318_p9), %v1679_v19  ;;  %1688 = vmatprep.subr.bf16.mxu0 (!%p318_p9), %v1687_v25 }
  0x15   : > { %1684 = vmatprep.subr.bf16.mxu1 (!%p318_p9), %v1683_v22  ;;  %v2077_v28 = vstv (!%p318_p9), %s362_s13  ;;  %s1479_s13 = sshll.u32 (!%p318_p9), %s1986_s9, 11 }
  0x16   : > { %s2311_s22 = scalar_lea.hbm (!%p318_p9), %s2371_s10, %s1479_s13 }
  0x17   : > { %s2379_s28 = smov (!%p356_p10, %s1404_s28), 31 }
  0x18   : > { %s1405_s29 = sshll.u32 %s2379_s28, 3  ;;  %1686 = vmatpush3.bf16.msra.mxu1 %v1683_v22  ;;  %s352_s28 = sand.u32 1, %s1894_s16  }
  0x19   : > { %s2020_s12 = scalar_lea.vmem %s2361_s0, %s1405_s29  ;;  %s1403_s11 = sshll.u32 %s352_s28, 7 }
  0x1a   : > { %v363_v1 = vld [vmem:[%s2020_s12] sm:$0xff]  ;;  %v364_v2 = vld [vmem:[%s2020_s12 + $0x8] sm:$0xff]  ;;  %v365_v3 = vld [vmem:[%s2020_s12 + $0x10] sm:$0xff]  ;;  %s2320_s9 = scalar_lea.sflag [#allocation4], %s352_s28  ;;  %s1844_s29 = sshll.u32 %s1904_s27, 4  ;;  %s1845_s29 = int_to_ptr.vmem [resolvable:$false] %s1844_s29 }
  0x1b   : > { %1559 = vmatprep.mubr.msk.f32.mxu0 %vm387_vm0, %v363_v1  ;;  %v366_v4 = vld [vmem:[%s2020_s12 + $0x18] sm:$0xff]  ;;  %v367_v5 = vld [vmem:[%s2020_s12 + $0x20] sm:$0xff]  ;;  %v368_v6 = vld [vmem:[%s2020_s12 + $0x28] sm:$0xff]  ;;  %s1846_s30 = scalar_lea.vmem %s1845_s29, 4096 }
  0x1c   : > { %1560 = vmatmul.mubr.msk.f32.vlgmr.msra.gmra.mrb[0].mxu0 %vm387_vm0, %v364_v2  ;;  %v369_v7 = vld [vmem:[%s2020_s12 + $0x30] sm:$0xff]  ;;  %v370_v8 = vld [vmem:[%s2020_s12 + $0x38] sm:$0xff]  ;;  %v371_v9 = vld [vmem:[%s2020_s12 + $0x40] sm:$0xff] }
  0x1d   : > { %1562 = vmatprep.mubr.msk.f32.mxu0 %vm387_vm0, %v365_v3  ;;  %v372_v10 = vld [vmem:[%s2020_s12 + $0x48] sm:$0xff]  ;;  %v373_v11 = vld [vmem:[%s2020_s12 + $0x50] sm:$0xff]  ;;  %v374_v12 = vld [vmem:[%s2020_s12 + $0x58] sm:$0xff]  ;;  %1690 = vmatpush3.bf16.msra.mxu0 %v1687_v25 }
  0x1e   : > { %v375_v13 = vld [vmem:[%s2020_s12 + $0x60] sm:$0xff]  ;;  %v376_v14 = vld [vmem:[%s2020_s12 + $0x68] sm:$0xff]  ;;  %v377_v15 = vld [vmem:[%s2020_s12 + $0x70] sm:$0xff] }
  0x1f   : > { %v378_v16 = vld [vmem:[%s2020_s12 + $0x78] sm:$0xff]  ;;  %s2263_s12 = scalar_lea.vmem [#allocation3], %s1403_s11 }
  0x20   : > { %1563 = vmatmul.mubr.msk.f32.gmra.mrb[2].mxu0 %vm387_vm0, %v366_v4  ;;  %s1337_s14 = sshll.u32 %s2263_s12, 4  ;;  %s2313_s14 = int_to_ptr.vmem [resolvable:$true] %s1337_s14 }
  0x21   : > { %1565 = vmatprep.mubr.msk.f32.mxu0 %vm387_vm0, %v367_v5  ;;  %s1840_s26 = scalar_lea.vmem %s2313_s14, 2048  ;;  %p1847_p0 = scmp.lt.s32.totalorder %s2313_s14, %s1845_s29 }
  0x22   : > { %p1841_p11 = scmp.ne.s32.totalorder %s2313_s14, %s1840_s26  ;;  %p1848_p1 = scmp.lt.s32.totalorder %s1846_s30, %s1840_s26 }
  0x24   : > { %1566 = vmatmul.mubr.msk.f32.gmra.mrb[4].mxu0 %vm387_vm0, %v368_v6  ;;  %p1842_p12 = pnand %p1841_p11, %p2003_p5  ;;  %p1849_p2 = por %p1848_p1, %p1847_p0 }
  0x25   : > { %1568 = vmatprep.mubr.msk.f32.mxu0 %vm387_vm0, %v369_v7 }
  0x26   : > { %p1843_p13 = pneg %p1842_p12 }
  0x28   : > { %1569 = vmatmul.mubr.msk.f32.gmra.mrb[6].mxu0 %vm387_vm0, %v370_v8  ;;  %p1850_p3 = pnand %p1849_p2, %p1843_p13 }
  0x29   : > { %1571 = vmatprep.mubr.msk.f32.mxu0 %vm387_vm0, %v371_v9 }
  0x2c   : > { %1572 = vmatmul.mubr.msk.f32.gmra.mrb[8].mxu0 %vm387_vm0, %v372_v10 }
  0x2d   : > { %1574 = vmatprep.mubr.msk.f32.mxu0 %vm387_vm0, %v373_v11 }
  0x30   : > { %1575 = vmatmul.mubr.msk.f32.gmra.mrb[10].mxu0 %vm387_vm0, %v374_v12 }
  0x31   : > { %1577 = vmatprep.mubr.msk.f32.mxu0 %vm387_vm0, %v375_v13 }
  0x34   : > { %1578 = vmatmul.mubr.msk.f32.gmra.mrb[12].mxu0 %vm387_vm0, %v376_v14 }
  0x35   : > { %1580 = vmatprep.mubr.msk.f32.mxu0 %vm387_vm0, %v377_v15 }
  0x38   : > { %1581 = vmatmul.mubr.msk.f32.gmra.mrb[14].mxu0 %vm387_vm0, %v378_v16 }
  0xef   : > { %v1561_v27 = vpop.f32.mrb[0].mxu0 }
  0xf0   : > { %v508_v29 = vadd.f32 %v1561_v27, %v2075_v26  ;;  %v502_v30 = vpop.f32.mrb[1].mxu0 }
  0xf1   : > { %v503_v31 = vadd.f32 %v2075_v26, %v502_v30  ;;  %v854_v30 = vld [vmem:[%s2366_s5 + $0x18] sm:$0xff] }
  0xf2   : > { %v583_v32 = vmul.f32 %v2077_v28, %v508_v29  ;;  %v853_v29 = vld [vmem:[%s2366_s5 + $0x10] sm:$0xff] }
  0xf3   : > { %v582_v33 = vmul.f32 %v2077_v28, %v503_v31  ;;  %v1564_v34 = vpop.f32.mrb[2].mxu0  ;;  %v1691_v31 = vpack.c.bf16 %v854_v30, %v853_v29 }
  0xf4   : > { %v518_v35 = vadd.f32 %v1564_v34, %v2075_v26  ;;  %v512_v36 = vpop.f32.mrb[3].mxu0 }
  0xf5   : > { %1744 = vtanh.f32 %v582_v33  ;;  %v513_v37 = vadd.f32 %v2075_v26, %v512_v36  ;;  %1692 = vmatprep.subr.bf16.mxu0 %v1691_v31  ;;  %v1088_v33 = vld [vmem:[%s2368_s7 + $0x8] sm:$0xff] }
  0xf6   : > { %1746 = vtanh.f32 %v583_v32  ;;  %v585_v38 = vmul.f32 %v2077_v28, %v518_v35  ;;  %1694 = vmatpush3.bf16.msra.mxu0 %v1691_v31  ;;  %v1087_v32 = vld [vmem:[%s2368_s7] sm:$0xff] }
  0xf7   : > { %v584_v39 = vmul.f32 %v2077_v28, %v513_v37  ;;  %v1567_v40 = vpop.f32.mrb[4].mxu0  ;;  %v1695_v34 = vpack.c.bf16 %v1088_v33, %v1087_v32  ;;  %v2142_v35 = vld [vmem:[%s2365_s4] ss:$0 sm:$0xff] }
  0xf8   : > { %v528_v41 = vadd.f32 %v1567_v40, %v2075_v26  ;;  %v522_v42 = vpop.f32.mrb[5].mxu0 }
  0xf9   : > { %1748 = vtanh.f32 %v584_v39  ;;  %v523_v43 = vadd.f32 %v2075_v26, %v522_v42  ;;  %1696 = vmatprep.subr.bf16.mxu1 %v1695_v34 }
  0xfa   : > { %1750 = vtanh.f32 %v585_v38  ;;  %v587_v44 = vmul.f32 %v2077_v28, %v528_v41 }
  0xfb   : > { %v586_v45 = vmul.f32 %v2077_v28, %v523_v43  ;;  %v1570_v46 = vpop.f32.mrb[6].mxu0 }
  0xfc   : > { %v538_v47 = vadd.f32 %v1570_v46, %v2075_v26  ;;  %v532_v48 = vpop.f32.mrb[7].mxu0 }
  0xfd   : > { %1752 = vtanh.f32 %v586_v45  ;;  %v533_v49 = vadd.f32 %v2075_v26, %v532_v48 }
  0xfe   : > { %1754 = vtanh.f32 %v587_v44  ;;  %v589_v50 = vmul.f32 %v2077_v28, %v538_v47 }
  0xff   : > { %v1745_v51 = vpop.eup %1744  ;;  %v588_v52 = vmul.f32 %v2077_v28, %v533_v49  ;;  %v1573_v53 = vpop.f32.mrb[8].mxu0 }
 0x100   : > { %v1747_v54 = vpop.eup %1746  ;;  %v548_v55 = vadd.f32 %v1573_v53, %v2075_v26  ;;  %v542_v56 = vpop.f32.mrb[9].mxu0  ;;  %1591 = vmatprep.mubr.msk.f32.mxu1 %vm625_vm1, %v1745_v51 }
 0x101   : > { %1756 = vtanh.f32 %v588_v52  ;;  %v543_v57 = vadd.f32 %v2075_v26, %v542_v56  ;;  %1592 = vmatmul.mubr.msk.f32.vlgmr.msra.gmra.mrb[0].mxu1 %vm625_vm1, %v1747_v54 }
 0x102   : > { %1758 = vtanh.f32 %v589_v50  ;;  %v591_v58 = vmul.f32 %v2077_v28, %v548_v55  ;;  %1698 = vmatpush3.bf16.msra.mxu1 %v1695_v34 }
 0x103   : > { %v1749_v59 = vpop.eup %1748  ;;  %v590_v60 = vmul.f32 %v2077_v28, %v543_v57  ;;  %v1576_v61 = vpop.f32.mrb[10].mxu0 }
 0x104   : > { %v1751_v62 = vpop.eup %1750  ;;  %v558_v63 = vadd.f32 %v1576_v61, %v2075_v26  ;;  %v552_v0 = vpop.f32.mrb[11].mxu0  ;;  %1594 = vmatprep.mubr.msk.f32.mxu1 %vm625_vm1, %v1749_v59 }
 0x105   : > { %1760 = vtanh.f32 %v590_v60  ;;  %v553_v1 = vadd.f32 %v2075_v26, %v552_v0  ;;  %1595 = vmatmul.mubr.msk.f32.gmra.mrb[2].mxu1 %vm625_vm1, %v1751_v62 }
 0x106   : > { %1762 = vtanh.f32 %v591_v58  ;;  %v593_v2 = vmul.f32 %v2077_v28, %v558_v63 }
 0x107   : > { %v1753_v3 = vpop.eup %1752  ;;  %v592_v4 = vmul.f32 %v2077_v28, %v553_v1  ;;  %v1579_v5 = vpop.f32.mrb[12].mxu0 }
 0x108   : > { %v1755_v6 = vpop.eup %1754  ;;  %v568_v7 = vadd.f32 %v1579_v5, %v2075_v26  ;;  %v562_v8 = vpop.f32.mrb[13].mxu0  ;;  %1597 = vmatprep.mubr.msk.f32.mxu1 %vm625_vm1, %v1753_v3 }
 0x109   : > { %1764 = vtanh.f32 %v592_v4  ;;  %v563_v9 = vadd.f32 %v2075_v26, %v562_v8  ;;  %1598 = vmatmul.mubr.msk.f32.gmra.mrb[4].mxu1 %vm625_vm1, %v1755_v6 }
 0x10a   : > { %1766 = vtanh.f32 %v593_v2  ;;  %v595_v10 = vmul.f32 %v2077_v28, %v568_v7 }
 0x10b   : > { %v1757_v11 = vpop.eup %1756  ;;  %v594_v12 = vmul.f32 %v2077_v28, %v563_v9  ;;  %v1582_v13 = vpop.f32.mrb[14].mxu0 }
 0x10c   : > { %v1759_v14 = vpop.eup %1758  ;;  %v578_v15 = vadd.f32 %v1582_v13, %v2075_v26  ;;  %v572_v16 = vpop.f32.mrb[15].mxu0  ;;  %1600 = vmatprep.mubr.msk.f32.mxu1 %vm625_vm1, %v1757_v11 }
 0x10d   : > { %1768 = vtanh.f32 %v594_v12  ;;  %v573_v17 = vadd.f32 %v2075_v26, %v572_v16  ;;  %1601 = vmatmul.mubr.msk.f32.gmra.mrb[6].mxu1 %vm625_vm1, %v1759_v14 }
 0x10e   : > { %1770 = vtanh.f32 %v595_v10  ;;  %v597_v18 = vmul.f32 %v2077_v28, %v578_v15 }
 0x10f   : > { %v1761_v19 = vpop.eup %1760  ;;  %v596_v20 = vmul.f32 %v2077_v28, %v573_v17 }
 0x110   : > { %v1763_v21 = vpop.eup %1762  ;;  %1603 = vmatprep.mubr.msk.f32.mxu1 %vm625_vm1, %v1761_v19 }
 0x111   : > { %1772 = vtanh.f32 %v596_v20  ;;  %1604 = vmatmul.mubr.msk.f32.gmra.mrb[8].mxu1 %vm625_vm1, %v1763_v21 }
 0x112   : > { %1774 = vtanh.f32 %v597_v18 }
 0x113   : > { %v1765_v22 = vpop.eup %1764 }
 0x114   : > { %v1767_v23 = vpop.eup %1766  ;;  %1606 = vmatprep.mubr.msk.f32.mxu1 %vm625_vm1, %v1765_v22 }
 0x115   : > { %1607 = vmatmul.mubr.msk.f32.gmra.mrb[10].mxu1 %vm625_vm1, %v1767_v23 }
 0x117   : > { %v1769_v24 = vpop.eup %1768 }
 0x118   : > { %v1771_v25 = vpop.eup %1770  ;;  %1609 = vmatprep.mubr.msk.f32.mxu1 %vm625_vm1, %v1769_v24 }
 0x119   : > { %1610 = vmatmul.mubr.msk.f32.gmra.mrb[12].mxu1 %vm625_vm1, %v1771_v25 }
 0x11b   : > { %v1773_v26 = vpop.eup %1772 }
 0x11c   : > { %v1775_v27 = vpop.eup %1774  ;;  %1612 = vmatprep.mubr.msk.f32.mxu1 %vm625_vm1, %v1773_v26 }
 0x11d   : > { %1613 = vmatmul.mubr.msk.f32.gmra.mrb[14].mxu1 %vm625_vm1, %v1775_v27 }
 0x1d4   : > { %v1593_v36 = vpop.f32.mrb[0].mxu1 }
 0x1d5   : > { %v746_v37 = vadd.f32 %v1593_v36, %v2142_v35  ;;  %v740_v38 = vpop.f32.mrb[1].mxu1 }
 0x1d6   : > { %v741_v39 = vadd.f32 %v2142_v35, %v740_v38  ;;  %v1090_v38 = vld [vmem:[%s2368_s7 + $0x18] sm:$0xff] }
 0x1d7   : > { %v820_v40 = vmul.f32 %v746_v37, %v2077_v28  ;;  %v1089_v37 = vld [vmem:[%s2368_s7 + $0x10] sm:$0xff] }
 0x1d8   : > { %v819_v41 = vmul.f32 %v741_v39, %v2077_v28  ;;  %v1596_v42 = vpop.f32.mrb[2].mxu1  ;;  %v1699_v39 = vpack.c.bf16 %v1090_v38, %v1089_v37 }
 0x1d9   : > { %v756_v43 = vadd.f32 %v1596_v42, %v2142_v35  ;;  %v750_v44 = vpop.f32.mrb[3].mxu1 }
 0x1da   : > { %1776 = vtanh.f32 %v819_v41  ;;  %v751_v45 = vadd.f32 %v2142_v35, %v750_v44  ;;  %1700 = vmatprep.subr.bf16.mxu1 %v1699_v39 }
 0x1db   : > { %1778 = vtanh.f32 %v820_v40  ;;  %v822_v46 = vmul.f32 %v756_v43, %v2077_v28  ;;  %1702 = vmatpush3.bf16.msra.mxu1 %v1699_v39  ;;  %v2201_v40 = vld [vmem:[%s2367_s6] ss:$0 sm:$0xff] }
 0x1dc   : > { %v821_v47 = vmul.f32 %v751_v45, %v2077_v28  ;;  %v1599_v48 = vpop.f32.mrb[4].mxu1 }
 0x1dd   : > { %v766_v49 = vadd.f32 %v1599_v48, %v2142_v35  ;;  %v760_v50 = vpop.f32.mrb[5].mxu1 }
 0x1de   : > { %1780 = vtanh.f32 %v821_v47  ;;  %v761_v51 = vadd.f32 %v2142_v35, %v760_v50 }
 0x1df   : > { %1782 = vtanh.f32 %v822_v46  ;;  %v824_v52 = vmul.f32 %v766_v49, %v2077_v28 }
 0x1e0   : > { %v823_v53 = vmul.f32 %v761_v51, %v2077_v28  ;;  %v1602_v54 = vpop.f32.mrb[6].mxu1 }
 0x1e1   : > { %v776_v55 = vadd.f32 %v1602_v54, %v2142_v35  ;;  %v770_v56 = vpop.f32.mrb[7].mxu1 }
 0x1e2   : > { %1784 = vtanh.f32 %v823_v53  ;;  %v771_v57 = vadd.f32 %v2142_v35, %v770_v56 }
 0x1e3   : > { %1786 = vtanh.f32 %v824_v52  ;;  %v826_v58 = vmul.f32 %v776_v55, %v2077_v28 }
 0x1e4   : > { %v1777_v59 = vpop.eup %1776  ;;  %v825_v60 = vmul.f32 %v771_v57, %v2077_v28  ;;  %v1605_v61 = vpop.f32.mrb[8].mxu1 }
 0x1e5   : > { %v1779_v62 = vpop.eup %1778  ;;  %v786_v63 = vadd.f32 %v1605_v61, %v2142_v35  ;;  %v780_v0 = vpop.f32.mrb[9].mxu1  ;;  %1623 = vmatprep.mubr.msk.f32.mxu0 %vm625_vm1, %v1777_v59 }
 0x1e6   : > { %1788 = vtanh.f32 %v825_v60  ;;  %v781_v1 = vadd.f32 %v2142_v35, %v780_v0  ;;  %1624 = vmatmul.mubr.msk.f32.vlgmr.msra.gmra.mrb[16].mxu0 %vm625_vm1, %v1779_v62 }
 0x1e7   : > { %1790 = vtanh.f32 %v826_v58  ;;  %v828_v2 = vmul.f32 %v786_v63, %v2077_v28 }
 0x1e8   : > { %v1781_v3 = vpop.eup %1780  ;;  %v827_v4 = vmul.f32 %v781_v1, %v2077_v28  ;;  %v1608_v5 = vpop.f32.mrb[10].mxu1 }
 0x1e9   : > { %v1783_v6 = vpop.eup %1782  ;;  %v796_v7 = vadd.f32 %v1608_v5, %v2142_v35  ;;  %v790_v8 = vpop.f32.mrb[11].mxu1  ;;  %1626 = vmatprep.mubr.msk.f32.mxu0 %vm625_vm1, %v1781_v3 }
 0x1ea   : > { %1792 = vtanh.f32 %v827_v4  ;;  %v791_v9 = vadd.f32 %v2142_v35, %v790_v8  ;;  %1627 = vmatmul.mubr.msk.f32.gmra.mrb[18].mxu0 %vm625_vm1, %v1783_v6 }
 0x1eb   : > { %1794 = vtanh.f32 %v828_v2  ;;  %v830_v10 = vmul.f32 %v796_v7, %v2077_v28 }
 0x1ec   : > { %v1785_v11 = vpop.eup %1784  ;;  %v829_v12 = vmul.f32 %v791_v9, %v2077_v28  ;;  %v1611_v13 = vpop.f32.mrb[12].mxu1 }
 0x1ed   : > { %v1787_v14 = vpop.eup %1786  ;;  %v806_v15 = vadd.f32 %v1611_v13, %v2142_v35  ;;  %v800_v16 = vpop.f32.mrb[13].mxu1  ;;  %1629 = vmatprep.mubr.msk.f32.mxu0 %vm625_vm1, %v1785_v11 }
 0x1ee   : > { %1796 = vtanh.f32 %v829_v12  ;;  %v801_v17 = vadd.f32 %v2142_v35, %v800_v16  ;;  %1630 = vmatmul.mubr.msk.f32.gmra.mrb[20].mxu0 %vm625_vm1, %v1787_v14 }
 0x1ef   : > { %1798 = vtanh.f32 %v830_v10  ;;  %v832_v18 = vmul.f32 %v806_v15, %v2077_v28 }
 0x1f0   : > { %v1789_v19 = vpop.eup %1788  ;;  %v831_v20 = vmul.f32 %v801_v17, %v2077_v28  ;;  %v1614_v21 = vpop.f32.mrb[14].mxu1 }
 0x1f1   : > { %v1791_v22 = vpop.eup %1790  ;;  %v816_v23 = vadd.f32 %v1614_v21, %v2142_v35  ;;  %v810_v24 = vpop.f32.mrb[15].mxu1  ;;  %1632 = vmatprep.mubr.msk.f32.mxu0 %vm625_vm1, %v1789_v19 }
 0x1f2   : > { %1800 = vtanh.f32 %v831_v20  ;;  %v811_v25 = vadd.f32 %v2142_v35, %v810_v24  ;;  %1633 = vmatmul.mubr.msk.f32.gmra.mrb[22].mxu0 %vm625_vm1, %v1791_v22 }
 0x1f3   : > { %1802 = vtanh.f32 %v832_v18  ;;  %v834_v26 = vmul.f32 %v816_v23, %v2077_v28 }
 0x1f4   : > { %v1793_v27 = vpop.eup %1792  ;;  %v833_v29 = vmul.f32 %v811_v25, %v2077_v28 }
 0x1f5   : > { %v1795_v30 = vpop.eup %1794  ;;  %1635 = vmatprep.mubr.msk.f32.mxu0 %vm625_vm1, %v1793_v27 }
 0x1f6   : > { %1804 = vtanh.f32 %v833_v29  ;;  %1636 = vmatmul.mubr.msk.f32.gmra.mrb[24].mxu0 %vm625_vm1, %v1795_v30 }
 0x1f7   : > { %1806 = vtanh.f32 %v834_v26 }
 0x1f8   : > { %v1797_v31 = vpop.eup %1796 }
 0x1f9   : > { %v1799_v32 = vpop.eup %1798  ;;  %1638 = vmatprep.mubr.msk.f32.mxu0 %vm625_vm1, %v1797_v31 }
 0x1fa   : > { %1639 = vmatmul.mubr.msk.f32.gmra.mrb[26].mxu0 %vm625_vm1, %v1799_v32 }
 0x1fc   : > { %v1801_v33 = vpop.eup %1800 }
 0x1fd   : > { %v1803_v34 = vpop.eup %1802  ;;  %1641 = vmatprep.mubr.msk.f32.mxu0 %vm625_vm1, %v1801_v33 }
 0x1fe   : > { %1642 = vmatmul.mubr.msk.f32.gmra.mrb[28].mxu0 %vm625_vm1, %v1803_v34 }
 0x200   : > { %v1805_v35 = vpop.eup %1804 }
 0x201   : > { %v1807_v36 = vpop.eup %1806  ;;  %1644 = vmatprep.mubr.msk.f32.mxu0 %vm625_vm1, %v1805_v35 }
 0x202   : > { %1645 = vmatmul.mubr.msk.f32.gmra.mrb[30].mxu0 %vm625_vm1, %v1807_v36 }
 0x2b9   : > { %v1625_v41 = vpop.f32.mrb[16].mxu0 }
 0x2ba   : > { %v982_v42 = vadd.f32 %v1625_v41, %v2201_v40  ;;  %v976_v43 = vpop.f32.mrb[17].mxu0 }
 0x2bb   : > { %v977_v44 = vadd.f32 %v2201_v40, %v976_v43 }
 0x2bc   : > { %v1056_v45 = vmul.f32 %v982_v42, %v2077_v28  ;;  %v2255_v42 = vld [vmem:[%s2369_s8] ss:$0 sm:$0xff] }
 0x2bd   : > { %v1055_v46 = vmul.f32 %v977_v44, %v2077_v28  ;;  %v1628_v47 = vpop.f32.mrb[18].mxu0 }
 0x2be   : > { %v992_v48 = vadd.f32 %v1628_v47, %v2201_v40  ;;  %v986_v49 = vpop.f32.mrb[19].mxu0 }
 0x2bf   : > { %1808 = vtanh.f32 %v1055_v46  ;;  %v987_v50 = vadd.f32 %v2201_v40, %v986_v49 }
 0x2c0   : > { %1810 = vtanh.f32 %v1056_v45  ;;  %v1058_v51 = vmul.f32 %v992_v48, %v2077_v28 }
 0x2c1   : > { %v1057_v52 = vmul.f32 %v987_v50, %v2077_v28  ;;  %v1631_v53 = vpop.f32.mrb[20].mxu0 }
 0x2c2   : > { %v1002_v54 = vadd.f32 %v1631_v53, %v2201_v40  ;;  %v996_v55 = vpop.f32.mrb[21].mxu0 }
 0x2c3   : > { %1812 = vtanh.f32 %v1057_v52  ;;  %v997_v56 = vadd.f32 %v2201_v40, %v996_v55 }
 0x2c4   : > { %1814 = vtanh.f32 %v1058_v51  ;;  %v1060_v57 = vmul.f32 %v1002_v54, %v2077_v28 }
 0x2c5   : > { %v1059_v58 = vmul.f32 %v997_v56, %v2077_v28  ;;  %v1634_v59 = vpop.f32.mrb[22].mxu0 }
 0x2c6   : > { %v1012_v60 = vadd.f32 %v1634_v59, %v2201_v40  ;;  %v1006_v61 = vpop.f32.mrb[23].mxu0 }
 0x2c7   : > { %1816 = vtanh.f32 %v1059_v58  ;;  %v1007_v62 = vadd.f32 %v2201_v40, %v1006_v61 }
 0x2c8   : > { %1818 = vtanh.f32 %v1060_v57  ;;  %v1062_v63 = vmul.f32 %v1012_v60, %v2077_v28 }
 0x2c9   : > { %v1809_v0 = vpop.eup %1808  ;;  %v1061_v1 = vmul.f32 %v1007_v62, %v2077_v28  ;;  %v1637_v2 = vpop.f32.mrb[24].mxu0 }
 0x2ca   : > { %v1811_v3 = vpop.eup %1810  ;;  %v1022_v4 = vadd.f32 %v1637_v2, %v2201_v40  ;;  %v1016_v5 = vpop.f32.mrb[25].mxu0  ;;  %1655 = vmatprep.mubr.msk.f32.mxu1 %vm625_vm1, %v1809_v0 }
 0x2cb   : > { %1820 = vtanh.f32 %v1061_v1  ;;  %v1017_v6 = vadd.f32 %v2201_v40, %v1016_v5  ;;  %1656 = vmatmul.mubr.msk.f32.vlgmr.msra.gmra.mrb[16].mxu1 %vm625_vm1, %v1811_v3 }
 0x2cc   : > { %1822 = vtanh.f32 %v1062_v63  ;;  %v1064_v7 = vmul.f32 %v1022_v4, %v2077_v28 }
 0x2cd   : > { %v1813_v8 = vpop.eup %1812  ;;  %v1063_v9 = vmul.f32 %v1017_v6, %v2077_v28  ;;  %v1640_v10 = vpop.f32.mrb[26].mxu0 }
 0x2ce   : > { %v1815_v11 = vpop.eup %1814  ;;  %v1032_v12 = vadd.f32 %v1640_v10, %v2201_v40  ;;  %v1026_v13 = vpop.f32.mrb[27].mxu0  ;;  %1658 = vmatprep.mubr.msk.f32.mxu1 %vm625_vm1, %v1813_v8 }
 0x2cf   : > { %1824 = vtanh.f32 %v1063_v9  ;;  %v1027_v14 = vadd.f32 %v2201_v40, %v1026_v13  ;;  %1659 = vmatmul.mubr.msk.f32.gmra.mrb[18].mxu1 %vm625_vm1, %v1815_v11 }
 0x2d0   : > { %1826 = vtanh.f32 %v1064_v7  ;;  %v1066_v15 = vmul.f32 %v1032_v12, %v2077_v28 }
 0x2d1   : > { %v1817_v16 = vpop.eup %1816  ;;  %v1065_v17 = vmul.f32 %v1027_v14, %v2077_v28  ;;  %v1643_v18 = vpop.f32.mrb[28].mxu0 }
 0x2d2   : > { %v1819_v19 = vpop.eup %1818  ;;  %v1042_v20 = vadd.f32 %v1643_v18, %v2201_v40  ;;  %v1036_v21 = vpop.f32.mrb[29].mxu0  ;;  %1661 = vmatprep.mubr.msk.f32.mxu1 %vm625_vm1, %v1817_v16 }
 0x2d3   : > { %1828 = vtanh.f32 %v1065_v17  ;;  %v1037_v22 = vadd.f32 %v2201_v40, %v1036_v21  ;;  %1662 = vmatmul.mubr.msk.f32.gmra.mrb[20].mxu1 %vm625_vm1, %v1819_v19 }
 0x2d4   : > { %1830 = vtanh.f32 %v1066_v15  ;;  %v1068_v23 = vmul.f32 %v1042_v20, %v2077_v28 }
 0x2d5   : > { %v1821_v24 = vpop.eup %1820  ;;  %v1067_v25 = vmul.f32 %v1037_v22, %v2077_v28  ;;  %v1646_v26 = vpop.f32.mrb[30].mxu0 }
 0x2d6   : > { %v1823_v27 = vpop.eup %1822  ;;  %v1052_v29 = vadd.f32 %v1646_v26, %v2201_v40  ;;  %v1046_v30 = vpop.f32.mrb[31].mxu0  ;;  %1664 = vmatprep.mubr.msk.f32.mxu1 %vm625_vm1, %v1821_v24 }
 0x2d7   : > { %1832 = vtanh.f32 %v1067_v25  ;;  %v1047_v31 = vadd.f32 %v2201_v40, %v1046_v30  ;;  %1665 = vmatmul.mubr.msk.f32.gmra.mrb[22].mxu1 %vm625_vm1, %v1823_v27 }
 0x2d8   : > { %1834 = vtanh.f32 %v1068_v23  ;;  %v1070_v32 = vmul.f32 %v1052_v29, %v2077_v28 }
 0x2d9   : > { %v1825_v33 = vpop.eup %1824  ;;  %v1069_v34 = vmul.f32 %v1047_v31, %v2077_v28 }
 0x2da   : > { %v1827_v35 = vpop.eup %1826  ;;  %1667 = vmatprep.mubr.msk.f32.mxu1 %vm625_vm1, %v1825_v33 }
 0x2db   : > { %1836 = vtanh.f32 %v1069_v34  ;;  %1668 = vmatmul.mubr.msk.f32.gmra.mrb[24].mxu1 %vm625_vm1, %v1827_v35 }
 0x2dc   : > { %1838 = vtanh.f32 %v1070_v32 }
 0x2dd   : > { %v1829_v36 = vpop.eup %1828 }
 0x2de   : > { %v1831_v37 = vpop.eup %1830  ;;  %1670 = vmatprep.mubr.msk.f32.mxu1 %vm625_vm1, %v1829_v36 }
 0x2df   : > { %1671 = vmatmul.mubr.msk.f32.gmra.mrb[26].mxu1 %vm625_vm1, %v1831_v37 }
 0x2e1   : > { %v1833_v38 = vpop.eup %1832 }
 0x2e2   : > { %v1835_v39 = vpop.eup %1834  ;;  %1673 = vmatprep.mubr.msk.f32.mxu1 %vm625_vm1, %v1833_v38 }
 0x2e3   : > { %1674 = vmatmul.mubr.msk.f32.gmra.mrb[28].mxu1 %vm625_vm1, %v1835_v39 }
 0x2e5   : > { %v1837_v40 = vpop.eup %1836 }
 0x2e6   : > { %v1839_v41 = vpop.eup %1838  ;;  %1676 = vmatprep.mubr.msk.f32.mxu1 %vm625_vm1, %v1837_v40 }
 0x2e7   : > { %1677 = vmatmul.mubr.msk.f32.gmra.mrb[30].mxu1 %vm625_vm1, %v1839_v41 }
 0x39e   : > { %v1657_v43 = vpop.f32.mrb[16].mxu1 }
 0x39f   : > { %v1218_v44 = vadd.f32 %v1657_v43, %v2255_v42  ;;  %v1212_v45 = vpop.f32.mrb[17].mxu1 }
 0x3a0   : > { %v1213_v46 = vadd.f32 %v2255_v42, %v1212_v45 }
 0x3a1   : > { %v1292_v47 = vmul.f32 %v1218_v44, %v2077_v28 }
 0x3a2   : > { %v1291_v48 = vmul.f32 %v1213_v46, %v2077_v28  ;;  %v1660_v49 = vpop.f32.mrb[18].mxu1 }
 0x3a3   : > { %1308 = vst [vmem:[%s2263_s12 + $0x8] sm:$0xff] %v1292_v47  ;;  %v1228_v50 = vadd.f32 %v1660_v49, %v2255_v42  ;;  %v1222_v51 = vpop.f32.mrb[19].mxu1 }
 0x3a4   : > { %1307 = vst [vmem:[%s2263_s12] sm:$0xff] %v1291_v48  ;;  %v1223_v52 = vadd.f32 %v2255_v42, %v1222_v51 }
 0x3a5   : > { %v1294_v53 = vmul.f32 %v1228_v50, %v2077_v28 }
 0x3a6   : > { %v1293_v54 = vmul.f32 %v1223_v52, %v2077_v28  ;;  %v1663_v55 = vpop.f32.mrb[20].mxu1 }
 0x3a7   : > { %1310 = vst [vmem:[%s2263_s12 + $0x18] sm:$0xff] %v1294_v53  ;;  %v1238_v56 = vadd.f32 %v1663_v55, %v2255_v42  ;;  %v1232_v57 = vpop.f32.mrb[21].mxu1 }
 0x3a8   : > { %1309 = vst [vmem:[%s2263_s12 + $0x10] sm:$0xff] %v1293_v54  ;;  %v1233_v58 = vadd.f32 %v2255_v42, %v1232_v57 }
 0x3a9   : > { %v1296_v59 = vmul.f32 %v1238_v56, %v2077_v28 }
 0x3aa   : > { %v1295_v60 = vmul.f32 %v1233_v58, %v2077_v28  ;;  %v1666_v61 = vpop.f32.mrb[22].mxu1 }
 0x3ab   : > { %1312 = vst [vmem:[%s2263_s12 + $0x28] sm:$0xff] %v1296_v59  ;;  %v1248_v62 = vadd.f32 %v1666_v61, %v2255_v42  ;;  %v1242_v63 = vpop.f32.mrb[23].mxu1 }
 0x3ac   : > { %1311 = vst [vmem:[%s2263_s12 + $0x20] sm:$0xff] %v1295_v60  ;;  %v1243_v0 = vadd.f32 %v2255_v42, %v1242_v63 }
 0x3ad   : > { %v1298_v1 = vmul.f32 %v1248_v62, %v2077_v28 }
 0x3ae   : > { %v1297_v2 = vmul.f32 %v1243_v0, %v2077_v28  ;;  %v1669_v3 = vpop.f32.mrb[24].mxu1 }
 0x3af   : > { %1314 = vst [vmem:[%s2263_s12 + $0x38] sm:$0xff] %v1298_v1  ;;  %v1258_v4 = vadd.f32 %v1669_v3, %v2255_v42  ;;  %v1252_v5 = vpop.f32.mrb[25].mxu1 }
 0x3b0   : > { %1313 = vst [vmem:[%s2263_s12 + $0x30] sm:$0xff] %v1297_v2  ;;  %v1253_v6 = vadd.f32 %v2255_v42, %v1252_v5 }
 0x3b1   : > { %v1300_v7 = vmul.f32 %v1258_v4, %v2077_v28 }
 0x3b2   : > { %v1299_v8 = vmul.f32 %v1253_v6, %v2077_v28  ;;  %v1672_v9 = vpop.f32.mrb[26].mxu1 }
 0x3b3   : > { %1316 = vst [vmem:[%s2263_s12 + $0x48] sm:$0xff] %v1300_v7  ;;  %v1268_v10 = vadd.f32 %v1672_v9, %v2255_v42  ;;  %v1262_v11 = vpop.f32.mrb[27].mxu1 }
 0x3b4   : > { %1315 = vst [vmem:[%s2263_s12 + $0x40] sm:$0xff] %v1299_v8  ;;  %v1263_v12 = vadd.f32 %v2255_v42, %v1262_v11 }
 0x3b5   : > { %v1302_v13 = vmul.f32 %v1268_v10, %v2077_v28 }
 0x3b6   : > { %v1301_v14 = vmul.f32 %v1263_v12, %v2077_v28  ;;  %v1675_v15 = vpop.f32.mrb[28].mxu1 }
 0x3b7   : > { %1318 = vst [vmem:[%s2263_s12 + $0x58] sm:$0xff] %v1302_v13  ;;  %v1278_v16 = vadd.f32 %v1675_v15, %v2255_v42  ;;  %v1272_v17 = vpop.f32.mrb[29].mxu1 }
 0x3b8   : > { %1317 = vst [vmem:[%s2263_s12 + $0x50] sm:$0xff] %v1301_v14  ;;  %v1273_v18 = vadd.f32 %v2255_v42, %v1272_v17 }
 0x3b9   : > { %v1304_v19 = vmul.f32 %v1278_v16, %v2077_v28 }
 0x3ba   : > { %v1303_v20 = vmul.f32 %v1273_v18, %v2077_v28  ;;  %v1678_v21 = vpop.f32.mrb[30].mxu1 }
 0x3bb   : > { %1320 = vst [vmem:[%s2263_s12 + $0x68] sm:$0xff] %v1304_v19  ;;  %v1288_v22 = vadd.f32 %v1678_v21, %v2255_v42  ;;  %v1282_v23 = vpop.f32.mrb[31].mxu1 }
 0x3bc   : > { %1319 = vst [vmem:[%s2263_s12 + $0x60] sm:$0xff] %v1303_v20  ;;  %v1283_v24 = vadd.f32 %v2255_v42, %v1282_v23 }
 0x3bd   : > { %v1306_v25 = vmul.f32 %v1288_v22, %v2077_v28 }
 0x3be   : > { %v1305_v26 = vmul.f32 %v1283_v24, %v2077_v28 }
 0x3bf   : > { %1322 = vst [vmem:[%s2263_s12 + $0x78] sm:$0xff] %v1306_v25 }
 0x3c0   : > { %1321 = vst [vmem:[%s2263_s12 + $0x70] sm:$0xff] %v1305_v26 }
 0x3c1   : > { %1853 = shalt.err (!%p1850_p3)
}
 0x3c2   : > { %s1854_s28 = scalar_lea.hbm %s2311_s22, 2048  ;;  %s1858_s13 = scalar_lea.hbm %s2371_s10, 4096 }
 0x3c3   : > { %p1855_p4 = scmp.ne.s32.totalorder %s2311_s22, %s1854_s28  ;;  %p1859_p9 = scmp.lt.u32.totalorder %s2311_s22, %s2371_s10 }
 0x3c4   : > { %p1860_p10 = scmp.lt.u32.totalorder %s1858_s13, %s1854_s28  ;;  %p1862_p12 = scmp.lt.u32.totalorder %s1854_s28, %s2311_s22 }
 0x3c5   : > { %p1856_p7 = pnand %p1855_p4, %p2003_p5 }
 0x3c6   : > { %p1861_p11 = por %p1860_p10, %p1859_p9 }
 0x3c7   : > { %p1857_p8 = pneg %p1856_p7 }
 0x3c8   : > { %p1863_p13 = por %p1862_p12, %p1861_p11 }
 0x3ca   : > { %p1864_p0 = pnand %p1863_p13, %p1857_p8 }
 0x3cc   : > { %1867 = shalt.err (!%p1864_p0)
}
 0x3cd   : > { %s1905_s26 = smov 128   ;;  %s1906_s27 = smov 8  }
 0x3ce   : > { %1703 = dma.vmem_to_hbm [thread:$0]  (%p2003_p5), %s2313_s14, 2048, %s2311_s22, %s2320_s9, %s1905_s26, %s1905_s26, %s1906_s27  }
 0x3cf PF: > { %p1709_p1 = scmp.ge.s32.totalorder %s1902_s18, 2  ;;  %s1352_s29 = sand.u32 1, %s1890_s15  }
 0x3d0   : > { %s1353_s30 = scalar_lea.sflag [#allocation4], %s1352_s29 }
 0x3d1   : > { %p1706_p2 = pnand %p1709_p1, %p2007_p6 }
 0x3d3   : > { %1885 = dma.done.wait (!%p1706_p2), %s1353_s30, 2048  }
 0x3d4   : > { %1887 = vsyncadd (!%p1706_p2), %s1353_s30, 4294965248  ;;  %p21_p3 = scmp.ge.s32.totalorder %s1990_s20, 4   ;;  %s2374_s15 = smov %s1894_s16 }
 0x3d5   : > { %s2375_s16 = smov %s1898_s17  ;;  %s2376_s17 = smov %s2001_s23 }
 0x3d6   : > { %s2377_s18 = smov %s1990_s20  ;;  %23 = sbr.rel (!%p21_p3) target bundleno = 5 (0x5), region = 95 }
 0x3dd   :  { %1358 = vsyncpa [#allocation4], 1 }
 0x3de   :  { %1360 = vsyncpa [#allocation4 + $0x1], 1 }

</bundles_post_ra>
